<compile_context>
chip_gen: v6e
topology: v6e:2x2x1
jax: 0.10.0
libtpu: 0.0.40
codegen_flags: <defaults>
</compile_context>

<pallas_src>
import jax
import jax.numpy as jnp
from jax.experimental import pallas as pl
from jax.experimental.pallas import tpu as pltpu


def _round_up(x, m):
    return ((x + m - 1) // m) * m


def _vmem_capacity_bytes():
    try:
        return int(getattr(pltpu.get_tpu_info(), "vmem_capacity_bytes", 128 << 20))
    except Exception:  # pragma: no cover - conservative fallback
        return 128 << 20


# --------------------- fused path (vocab fits a single VMEM tile) -----------

def _fused_kernel(x_ref, w_ref, b_ref, o_ref):
    # One matmul; logsumexp and normalization entirely in VMEM.
    logits = jnp.dot(x_ref[...], w_ref[...], preferred_element_type=jnp.float32)
    logits = logits + b_ref[...]
    m = jnp.max(logits, axis=-1, keepdims=True)
    lse = m + jnp.log(jnp.sum(jnp.exp(logits - m), axis=-1, keepdims=True))
    o_ref[...] = (logits - lse).astype(o_ref.dtype)


# --------------------- streaming path (large vocab) -------------------------

def _logits_lse_kernel(x_ref, w_ref, b_ref, logits_ref, lse_ref, m_ref, l_ref):
    # grid = (row_tiles, vocab_tiles); j is the online-logsumexp reduction axis.
    j = pl.program_id(1)

    @pl.when(j == 0)
    def _init():
        m_ref[...] = jnp.full_like(m_ref, -jnp.inf)
        l_ref[...] = jnp.zeros_like(l_ref)

    logits = jnp.dot(x_ref[...], w_ref[...], preferred_element_type=jnp.float32)
    logits = logits + b_ref[...]
    # Unnormalized logits go straight to HBM; the matmul is never redone.
    logits_ref[...] = logits.astype(logits_ref.dtype)

    m_prev = m_ref[...]
    m_new = jnp.maximum(m_prev, jnp.max(logits, axis=-1, keepdims=True))
    alpha = jnp.exp(m_prev - m_new)
    l_ref[...] = alpha * l_ref[...] + jnp.sum(
        jnp.exp(logits - m_new), axis=-1, keepdims=True)
    m_ref[...] = m_new

    @pl.when(j == pl.num_programs(1) - 1)
    def _finalize():
        # lse computed exactly once per row tile.
        lse_ref[...] = m_ref[...] + jnp.log(l_ref[...])


def _subtract_lse_kernel(logits_ref, lse_ref, o_ref):
    o_ref[...] = (logits_ref[...].astype(jnp.float32)
                  - lse_ref[...]).astype(o_ref.dtype)


# --------------------- wrapper ----------------------------------------------

def generator_forward(x, w, b, *, tm=None, tn=None,
                      compute_dtype=jnp.bfloat16, out_dtype=None):
    """log_softmax(x @ w + b, axis=-1).

    x: (batch, seq, d_model); w: (d_model, vocab) (nn.Linear weight
    transposed); b: (vocab,).
    """
    batch, seq, d_model = x.shape
    dw, vocab = w.shape
    assert dw == d_model, "weight / input d_model mismatch"
    if out_dtype is None:
        out_dtype = x.dtype
    # Padded vocab columns carry ~-1e30 (sliced away later) which would
    # overflow float16 on the output cast; bf16/f32 are fine.
    assert jnp.dtype(out_dtype) != jnp.dtype(jnp.float16), "use bf16/f32 output"

    M = batch * seq
    x2d = x.reshape(M, d_model)

    isz = jnp.dtype(compute_dtype).itemsize
    osz = jnp.dtype(out_dtype).itemsize

    vmem_cap = _vmem_capacity_bytes()
    vmem_budget = int(vmem_cap * 0.85)          # leave headroom for Mosaic
    small_vmem = vmem_cap <= (64 << 20)         # v7x: 64 MiB/TC, ~2x HBM BW

    if tm is None:
        tm = 512 if small_vmem else 1024
    if tn is None:
        tn = 512 if small_vmem else 1024

    # Row tile: multiple of 8 (sublane aligned), clamped to M.
    tm_eff = min(_round_up(tm, 8), _round_up(M, 8))
    # Vocab tile: multiple of 128 (lane-dense stores), clamped to padded vocab.
    v128 = _round_up(vocab, 128)
    tn_eff = min(_round_up(tn, 128), v128)

    def working_set(tm_e, tn_e):
        # Double-buffered x / weight-stripe / bias / logits blocks
        # + f32 scratch + slack for internals.
        return (2 * (tm_e * d_model * isz + d_model * tn_e * isz + tn_e * 4
                     + tm_e * tn_e * osz)
                + 4 * tm_e * 4 + (2 << 20))

    while tn_eff > 128 and working_set(tm_eff, tn_eff) > vmem_budget:
        tn_eff = max(128, _round_up(tn_eff // 2, 128))
    while tm_eff > 8 and working_set(tm_eff, tn_eff) > vmem_budget:
        tm_eff = max(8, _round_up(tm_eff // 2, 8))

    m_pad = _round_up(M, tm_eff)
    v_pad = _round_up(v128, tn_eff)

    if m_pad != M:
        x2d = jnp.pad(x2d, ((0, m_pad - M), (0, 0)))
    if v_pad != vocab:
        w = jnp.pad(w, ((0, 0), (0, v_pad - vocab)))
        # Padded vocab columns get a huge negative bias: exp underflows to 0 in
        # the logsumexp, so they never affect the real log-probs.
        b = jnp.pad(b, (0, v_pad - vocab), constant_values=-1e30)

    # No-ops when params are already stored in compute dtype.
    # TODO(synk): hoist weight cast/pad to parameter setup for repeated calls.
    x_in = x2d.astype(compute_dtype)
    w_in = w.astype(compute_dtype)
    b_in = b.reshape(1, v_pad).astype(jnp.float32)

    n_row_tiles = m_pad // tm_eff
    n_voc_tiles = v_pad // tn_eff

    if n_voc_tiles == 1:
        # ---------------- fused single-call path -----------------------------
        out2d = pl.pallas_call(
            _fused_kernel,
            out_shape=jax.ShapeDtypeStruct((m_pad, v_pad), out_dtype),
            grid_spec=pltpu.PrefetchScalarGridSpec(
                num_scalar_prefetch=0,
                grid=(n_row_tiles,),
                in_specs=[
                    pl.BlockSpec((tm_eff, d_model), lambda i: (i, 0)),
                    pl.BlockSpec((d_model, v_pad), lambda i: (0, 0)),
                    pl.BlockSpec((1, v_pad), lambda i: (0, 0)),
                ],
                out_specs=pl.BlockSpec((tm_eff, v_pad), lambda i: (i, 0)),
            ),
            compiler_params=pltpu.CompilerParams(
                dimension_semantics=("parallel",),
                vmem_limit_bytes=vmem_budget,
            ),
        )(x_in, w_in, b_in)
    else:
        # ---------------- streaming two-call path ----------------------------
        logits2d, lse = pl.pallas_call(
            _logits_lse_kernel,
            out_shape=(jax.ShapeDtypeStruct((m_pad, v_pad), out_dtype),
                       jax.ShapeDtypeStruct((m_pad, 1), jnp.float32)),
            grid_spec=pltpu.PrefetchScalarGridSpec(
                num_scalar_prefetch=0,
                grid=(n_row_tiles, n_voc_tiles),
                in_specs=[
                    # x row tile: resident across the vocab axis.
                    pl.BlockSpec((tm_eff, d_model), lambda i, j: (i, 0)),
                    # weight stripe over vocab, streamed exactly once.
                    pl.BlockSpec((d_model, tn_eff), lambda i, j: (0, j)),
                    pl.BlockSpec((1, tn_eff), lambda i, j: (0, j)),
                ],
                out_specs=(
                    pl.BlockSpec((tm_eff, tn_eff), lambda i, j: (i, j)),
                    # lse block resident across j; finalized at the last j.
                    pl.BlockSpec((tm_eff, 1), lambda i, j: (i, 0)),
                ),
                scratch_shapes=[
                    pltpu.VMEM((tm_eff, 1), jnp.float32),   # running max
                    pltpu.VMEM((tm_eff, 1), jnp.float32),   # running sum of exp
                ],
            ),
            compiler_params=pltpu.CompilerParams(
                dimension_semantics=("parallel", "arbitrary"),
                vmem_limit_bytes=vmem_budget,
            ),
        )(x_in, w_in, b_in)

        # Elementwise normalization: grow the vocab tile (no weight stripe
        # here) to amortize per-step overhead; writes in place via aliasing.
        tn2 = tn_eff
        while (tn2 * 2 <= v_pad and v_pad % (tn2 * 2) == 0
               and 2 * (2 * tm_eff * (tn2 * 2) * osz + tm_eff * 4) + (2 << 20)
                   <= vmem_budget):
            tn2 *= 2

        out2d = pl.pallas_call(
            _subtract_lse_kernel,
            out_shape=jax.ShapeDtypeStruct((m_pad, v_pad), out_dtype),
            grid_spec=pltpu.PrefetchScalarGridSpec(
                num_scalar_prefetch=0,
                grid=(n_row_tiles, v_pad // tn2),
                in_specs=[
                    pl.BlockSpec((tm_eff, tn2), lambda i, j: (i, j)),
                    pl.BlockSpec((tm_eff, 1), lambda i, j: (i, 0)),
                ],
                out_specs=pl.BlockSpec((tm_eff, tn2), lambda i, j: (i, j)),
            ),
            compiler_params=pltpu.CompilerParams(
                dimension_semantics=("parallel", "parallel"),
                vmem_limit_bytes=vmem_budget,
            ),
            input_output_aliases={0: 0},   # normalize the logits buffer in place
        )(logits2d, lse)

    return out2d[:M, :vocab].reshape(batch, seq, vocab)


def reference_forward(x, w, b):
    logits = jnp.einsum("bsd,dv->bsv",
                        x.astype(jnp.float32), w.astype(jnp.float32))
    logits = logits + b.astype(jnp.float32)
    return jax.nn.log_softmax(logits, axis=-1)


if __name__ == "__main__":
    key = jax.random.PRNGKey(0)
    kx, kw, kb = jax.random.split(key, 3)

    batch, seq, d_model, vocab = 2, 8, 128, 256
    bound = 1.0 / (d_model ** 0.5)
    w = jax.random.uniform(kw, (d_model, vocab), jnp.float32, -bound, bound)
    b = jax.random.uniform(kb, (vocab,), jnp.float32, -bound, bound)
    x = jax.random.normal(kx, (batch, seq, d_model), jnp.float32)

    ref = reference_forward(x, w, b)

    # Fused single-tile path (default tn), f32 compute.
    out_fused = generator_forward(x, w, b, compute_dtype=jnp.float32)
    out_fused = jax.block_until_ready(out_fused)
    assert out_fused.shape == (batch, seq, vocab)
    assert jnp.allclose(out_fused, ref, atol=1e-4, rtol=1e-4), "fused f32 mismatch"

    # Streaming path (tn=128 -> 2 vocab tiles): exercises the online logsumexp
    # + the elementwise normalization kernel.
    out_stream = generator_forward(x, w, b, tn=128, compute_dtype=jnp.float32)
    out_stream = jax.block_until_ready(out_stream)
    assert out_stream.shape == (batch, seq, vocab)
    assert jnp.allclose(out_stream, ref, atol=1e-4, rtol=1e-4), "stream f32 mismatch"

    # Default bf16 MXU path (f32 accumulation), fused.
    out_bf16 = generator_forward(x, w, b)
    out_bf16 = jax.block_until_ready(out_bf16)
    assert out_bf16.shape == (batch, seq, vocab)
    assert jnp.allclose(out_bf16, ref, atol=5e-2, rtol=5e-2), "bf16 path mismatch"

    # bf16 streaming path.
    out_bf16_s = generator_forward(x, w, b, tn=128)
    out_bf16_s = jax.block_until_ready(out_bf16_s)
    assert jnp.allclose(out_bf16_s, ref, atol=5e-2, rtol=5e-2), "bf16 stream mismatch"

    # Ragged vocab (not a multiple of 128) exercises the padding path on the
    # streaming kernels.
    vocab_r = 200
    w_r = w[:, :vocab_r]
    b_r = b[:vocab_r]
    ref_r = reference_forward(x, w_r, b_r)
    out_r = generator_forward(x, w_r, b_r, tn=128, compute_dtype=jnp.float32)
    out_r = jax.block_until_ready(out_r)
    assert out_r.shape == (batch, seq, vocab_r)
    assert jnp.allclose(out_r, ref_r, atol=1e-4, rtol=1e-4), "ragged vocab mismatch"

    print("KERNEL_OK")
</pallas_src>

<mosaic_0001>
module attributes {stable_mosaic.version = 11 : i64} {
  func.func @_fused_kernel(%arg0: i32, %arg1: memref<16x128xf32, #tpu.memory_space<vmem>>, %arg2: memref<128x256xf32, #tpu.memory_space<vmem>>, %arg3: memref<1x256xf32, #tpu.memory_space<vmem>>, %arg4: memref<16x256xf32, #tpu.memory_space<vmem>>) attributes {dimension_semantics = [#tpu.dimension_semantics<parallel>], iteration_bounds = array<i64: 1>, scalar_prefetch = 0 : i64, scratch_operands = 0 : i64, tpu.core_type = #tpu.core_type<tc>, window_params = [{transform_indices = @transform_0, window_bounds = array<i64: 16, 128>}, {pipeline_mode = #tpu.pipeline_mode<synchronous>, transform_indices = @transform_1, window_bounds = array<i64: 128, 256>}, {pipeline_mode = #tpu.pipeline_mode<synchronous>, transform_indices = @transform_2, window_bounds = array<i64: 1, 256>}, {transform_indices = @transform_3, window_bounds = array<i64: 16, 256>}]} {
    %c0 = arith.constant 0 : index
    %c0_0 = arith.constant 0 : index
    %0 = vector.load %arg1[%c0, %c0_0] : memref<16x128xf32, #tpu.memory_space<vmem>>, vector<16x128xf32>
    %c0_1 = arith.constant 0 : index
    %c0_2 = arith.constant 0 : index
    %1 = vector.load %arg2[%c0_1, %c0_2] : memref<128x256xf32, #tpu.memory_space<vmem>>, vector<128x256xf32>
    %cst = arith.constant dense<0.000000e+00> : vector<16x256xf32>
    %2 = tpu.matmul %0, %1, %cst {dimension_numbers = #tpu.dot_dimension_numbers<[1], [0], [0], [1], [0, 0, 1, 1], [], []>} : vector<16x128xf32>, vector<128x256xf32>, vector<16x256xf32> -> vector<16x256xf32>
    %c0_3 = arith.constant 0 : index
    %c0_4 = arith.constant 0 : index
    %3 = vector.load %arg3[%c0_3, %c0_4] : memref<1x256xf32, #tpu.memory_space<vmem>>, vector<1x256xf32>
    %4 = vector.broadcast %3 : vector<1x256xf32> to vector<16x256xf32>
    %5 = arith.addf %2, %4 : vector<16x256xf32>
    %cst_5 = arith.constant dense<0xFF800000> : vector<16xf32>
    %6 = vector.multi_reduction <maximumf>, %5, %cst_5 [1] : vector<16x256xf32> to vector<16xf32>
    %7 = vector.shape_cast %6 : vector<16xf32> to vector<16x1xf32>
    %8 = vector.broadcast %7 : vector<16x1xf32> to vector<16x256xf32>
    %9 = arith.subf %5, %8 : vector<16x256xf32>
    %10 = math.exp %9 : vector<16x256xf32>
    %cst_6 = arith.constant dense<0.000000e+00> : vector<16xf32>
    %11 = vector.multi_reduction <add>, %10, %cst_6 [1] : vector<16x256xf32> to vector<16xf32>
    %12 = vector.shape_cast %11 : vector<16xf32> to vector<16x1xf32>
    %13 = math.log %12 : vector<16x1xf32>
    %14 = arith.addf %7, %13 : vector<16x1xf32>
    %15 = vector.broadcast %14 : vector<16x1xf32> to vector<16x256xf32>
    %16 = arith.subf %5, %15 : vector<16x256xf32>
    %c0_7 = arith.constant 0 : index
    %c0_8 = arith.constant 0 : index
    %17 = vector.load %arg4[%c0_7, %c0_8] : memref<16x256xf32, #tpu.memory_space<vmem>>, vector<16x256xf32>
    tpu.vector_store %arg4[%c0_7, %c0_8], %16 {strides = array<i32>} : memref<16x256xf32, #tpu.memory_space<vmem>>, vector<16x256xf32>,
    return
  }
  func.func @transform_0(%arg0: i32) -> (i32, i32) {
    %c0_i32 = arith.constant 0 : i32
    %c0_i32_0 = arith.constant 0 : i32
    return %arg0, %c0_i32 : i32, i32
  }
  func.func @transform_1(%arg0: i32) -> (i32, i32) {
    %c0_i32 = arith.constant 0 : i32
    %c0_i32_0 = arith.constant 0 : i32
    %c0_i32_1 = arith.constant 0 : i32
    return %c0_i32, %c0_i32_0 : i32, i32
  }
  func.func @transform_2(%arg0: i32) -> (i32, i32) {
    %c0_i32 = arith.constant 0 : i32
    %c0_i32_0 = arith.constant 0 : i32
    %c0_i32_1 = arith.constant 0 : i32
    return %c0_i32, %c0_i32_0 : i32, i32
  }
  func.func @transform_3(%arg0: i32) -> (i32, i32) {
    %c0_i32 = arith.constant 0 : i32
    %c0_i32_0 = arith.constant 0 : i32
    return %arg0, %c0_i32 : i32, i32
  }
}

</mosaic_0001>

<bundles_post_ra>
// kernel: tpu_custom_call.1
= control target key start
LH: loop header
LB: loop body
LE: loop exit
PB: predicated region body
PF: predicated region fallthrough
CT: control target
= control target key end

     0   :  { %8 = vsyncpa [#allocation3], 0  ;;  %s386_s0 = inlined_call_operand.hbm [shape: f32[16,128], index: 0, kind: input, shape index: {}]   ;;  %s387_s1 = inlined_call_operand.hbm [shape: f32[128,256], index: 1, kind: input, shape index: {}]   ;;  %s388_s2 = inlined_call_operand.vmem [shape: f32[1,256], index: 2, kind: input, shape index: {}]   ;;  %s389_s3 = inlined_call_operand.hbm [shape: f32[16,256], index: 3, kind: output, shape index: {}]  }
   0x1   :  { %9 = vsyncpa [#allocation6], 0 }
   0x2   :  { %10 = vsyncpa [#allocation4], 0  ;;  %s340_s12 = smov [#allocation2]  }
   0x3   :  { %s16_s13 = sshll.u32 %s340_s12, 4  ;;  %s17_s13 = int_to_ptr.vmem [resolvable:$true] %s16_s13 }
   0x4   :  { %s282_s14 = scalar_lea.vmem %s17_s13, 256  ;;  %p287_p1 = scmp.lt.s32.totalorder %s17_s13, %s17_s13 }
   0x5   :  { %p283_p0 = scmp.ne.s32.totalorder %s17_s13, %s282_s14  ;;  %p288_p2 = scmp.lt.s32.totalorder %s282_s14, %s282_s14 }
   0x7   :  { %p289_p3 = por %p288_p2, %p287_p1 }
   0x9   :  { %p290_p4 = pnand %p289_p3, %p283_p0 }
   0xb   :  { %293 = shalt.err (!%p290_p4)
}
   0xc   :  { %s341_s15 = smov 128   ;;  %s342_s16 = smov 8  }
   0xd   :  { %22 = dma.hbm_to_vmem [thread:$0]  %s386_s0, 256, %s17_s13, [#allocation3], %s341_s15, %s341_s15, %s342_s16  }
   0xe   :  { %s343_s19 = smov [#allocation5]  }
   0xf   :  { %s28_s20 = sshll.u32 %s343_s19, 4  ;;  %s29_s20 = int_to_ptr.vmem [resolvable:$true] %s28_s20 }
  0x10   :  { %s302_s21 = scalar_lea.vmem %s29_s20, 4096  ;;  %p307_p6 = scmp.lt.s32.totalorder %s29_s20, %s29_s20 }
  0x11   :  { %p303_p5 = scmp.ne.s32.totalorder %s29_s20, %s302_s21  ;;  %p308_p7 = scmp.lt.s32.totalorder %s302_s21, %s302_s21 }
  0x13   :  { %p309_p8 = por %p308_p7, %p307_p6 }
  0x15   :  { %p310_p9 = pnand %p309_p8, %p303_p5 }
  0x17   :  { %313 = shalt.err (!%p310_p9)
}
  0x18   :  { %s344_s22 = smov 256   ;;  %s345_s23 = smov 16  }
  0x19   :  { %34 = dma.hbm_to_vmem [thread:$0]  %s387_s1, 4096, %s29_s20, [#allocation6], %s344_s22, %s344_s22, %s345_s23  }
  0x1a   :  { %334 = dma.done.wait [#allocation3], 256  }
  0x1b   :  { %335 = vsyncadd [#allocation3], 4294967040 }
  0x1c   :  { %336 = dma.done.wait [#allocation6], 4096  }
  0x1d   :  { %337 = vsyncadd [#allocation6], 4294963200  ;;  %v346_v0 = vmov 0.0   ;;  %v76_v1 = vld [vmem:[#allocation5 + $0xf8] sm:$0xff]  ;;  %v75_v2 = vld [vmem:[#allocation5 + $0xf0] sm:$0xff]  ;;  %v79_v35 = vlaneseq }
  0x1e   :  { %153 = vmatprep.mubr.f32.mxu0 %v346_v0  ;;  %159 = vmatprep.mubr.f32.mxu1 %v346_v0  ;;  %v74_v3 = vld [vmem:[#allocation5 + $0xe8] sm:$0xff]  ;;  %v73_v4 = vld [vmem:[#allocation5 + $0xe0] sm:$0xff]  ;;  %v72_v5 = vld [vmem:[#allocation5 + $0xd8] sm:$0xff] }
  0x1f   :  { %89 = vmatprep.subr.mxu0 %v76_v1  ;;  %222 = vmatprep.subr.mxu1 %v76_v1  ;;  %v71_v6 = vld [vmem:[#allocation5 + $0xd0] sm:$0xff]  ;;  %v70_v7 = vld [vmem:[#allocation5 + $0xc8] sm:$0xff]  ;;  %v69_v8 = vld [vmem:[#allocation5 + $0xc0] sm:$0xff]  ;;  %v80_v36 = vshrl.u32 %v79_v35, 7 }
  0x20   :  { %90 = vmatpush1.msra.mxu0 %v75_v2  ;;  %238 = vmatpush1.msra.mxu1 %v75_v2  ;;  %v68_v9 = vld [vmem:[#allocation5 + $0xb8] sm:$0xff]  ;;  %v67_v10 = vld [vmem:[#allocation5 + $0xb0] sm:$0xff]  ;;  %v66_v11 = vld [vmem:[#allocation5 + $0xa8] sm:$0xff] }
  0x21   :  { %91 = vmatprep.subr.mxu0 %v74_v3  ;;  %223 = vmatprep.subr.mxu1 %v74_v3  ;;  %v65_v12 = vld [vmem:[#allocation5 + $0xa0] sm:$0xff]  ;;  %v64_v13 = vld [vmem:[#allocation5 + $0x98] sm:$0xff]  ;;  %v63_v14 = vld [vmem:[#allocation5 + $0x90] sm:$0xff]  ;;  %v81_v37 = vsub.s32 0, %v80_v36  ;;  %v85_v38 = vsub.s32 1, %v80_v36 }
  0x22   :  { %92 = vmatpush1.msra.mxu0 %v73_v4  ;;  %239 = vmatpush1.msra.mxu1 %v73_v4  ;;  %v62_v15 = vld [vmem:[#allocation5 + $0x88] sm:$0xff]  ;;  %v61_v16 = vld [vmem:[#allocation5 + $0x80] sm:$0xff]  ;;  %v60_v17 = vld [vmem:[#allocation5 + $0x78] sm:$0xff] }
  0x23   :  { %93 = vmatprep.subr.mxu0 %v72_v5  ;;  %224 = vmatprep.subr.mxu1 %v72_v5  ;;  %v59_v18 = vld [vmem:[#allocation5 + $0x70] sm:$0xff]  ;;  %v58_v19 = vld [vmem:[#allocation5 + $0x68] sm:$0xff]  ;;  %v57_v20 = vld [vmem:[#allocation5 + $0x60] sm:$0xff] }
  0x24   :  { %94 = vmatpush1.msra.mxu0 %v71_v6  ;;  %240 = vmatpush1.msra.mxu1 %v71_v6  ;;  %v56_v21 = vld [vmem:[#allocation5 + $0x58] sm:$0xff]  ;;  %v55_v22 = vld [vmem:[#allocation5 + $0x50] sm:$0xff]  ;;  %v54_v23 = vld [vmem:[#allocation5 + $0x48] sm:$0xff] }
  0x25   :  { %95 = vmatprep.subr.mxu0 %v70_v7  ;;  %225 = vmatprep.subr.mxu1 %v70_v7  ;;  %v53_v24 = vld [vmem:[#allocation5 + $0x40] sm:$0xff]  ;;  %v52_v25 = vld [vmem:[#allocation5 + $0x38] sm:$0xff]  ;;  %v51_v26 = vld [vmem:[#allocation5 + $0x30] sm:$0xff] }
  0x26   :  { %96 = vmatpush1.msra.mxu0 %v69_v8  ;;  %241 = vmatpush1.msra.mxu1 %v69_v8  ;;  %v50_v27 = vld [vmem:[#allocation5 + $0x28] sm:$0xff]  ;;  %v49_v28 = vld [vmem:[#allocation5 + $0x20] sm:$0xff]  ;;  %v48_v29 = vld [vmem:[#allocation5 + $0x18] sm:$0xff] }
  0x27   :  { %97 = vmatprep.subr.mxu0 %v68_v9  ;;  %226 = vmatprep.subr.mxu1 %v68_v9  ;;  %v47_v30 = vld [vmem:[#allocation5 + $0x10] sm:$0xff]  ;;  %v46_v31 = vld [vmem:[#allocation5 + $0x8] sm:$0xff]  ;;  %v45_v32 = vld [vmem:[#allocation5] sm:$0xff] }
  0x28   :  { %98 = vmatpush1.msra.mxu0 %v67_v10  ;;  %242 = vmatpush1.msra.mxu1 %v67_v10  ;;  %v43_v33 = vld [vmem:[#allocation2] sm:$0xff]  ;;  %v44_v34 = vld [vmem:[#allocation2 + $0x8] sm:$0xff] }
  0x29   :  { %99 = vmatprep.subr.mxu0 %v66_v11  ;;  %227 = vmatprep.subr.mxu1 %v66_v11  ;;  %v77_v39 = vld [vmem:[%s388_s2] sm:$0x3]  ;;  %s347_s2 = smov [#allocation7]  }
  0x2a   :  { %100 = vmatpush1.msra.mxu0 %v65_v12  ;;  %243 = vmatpush1.msra.mxu1 %v65_v12  ;;  %v82_v40 = vrot.slane %v77_v39, %v81_v37  ;;  %v86_v41 = vrot.slane %v77_v39, %v85_v38  ;;  %s209_s26 = sshll.u32 %s347_s2, 4  ;;  %s210_s26 = int_to_ptr.vmem [resolvable:$true] %s209_s26 }
  0x2b   :  { %101 = vmatprep.subr.mxu0 %v64_v13  ;;  %228 = vmatprep.subr.mxu1 %v64_v13  ;;  %s314_s27 = scalar_lea.vmem %s210_s26, 512  ;;  %p319_p11 = scmp.lt.s32.totalorder %s210_s26, %s210_s26 }
  0x2c   :  { %102 = vmatpush1.msra.mxu0 %v63_v14  ;;  %244 = vmatpush1.msra.mxu1 %v63_v14  ;;  %p315_p10 = scmp.ne.s32.totalorder %s210_s26, %s314_s27  ;;  %p320_p12 = scmp.lt.s32.totalorder %s314_s27, %s314_s27 }
  0x2d   :  { %103 = vmatprep.subr.mxu0 %v62_v15  ;;  %229 = vmatprep.subr.mxu1 %v62_v15 }
  0x2e   :  { %104 = vmatpush1.msra.mxu0 %v61_v16  ;;  %245 = vmatpush1.msra.mxu1 %v61_v16  ;;  %p321_p13 = por %p320_p12, %p319_p11 }
  0x2f   :  { %105 = vmatprep.subr.mxu0 %v60_v17  ;;  %230 = vmatprep.subr.mxu1 %v60_v17 }
  0x30   :  { %106 = vmatpush1.msra.mxu0 %v59_v18  ;;  %246 = vmatpush1.msra.mxu1 %v59_v18  ;;  %p322_p0 = pnand %p321_p13, %p315_p10 }
  0x31   :  { %107 = vmatprep.subr.mxu0 %v58_v19  ;;  %231 = vmatprep.subr.mxu1 %v58_v19 }
  0x32   :  { %108 = vmatpush1.msra.mxu0 %v57_v20  ;;  %247 = vmatpush1.msra.mxu1 %v57_v20 }
  0x33   :  { %109 = vmatprep.subr.mxu0 %v56_v21  ;;  %232 = vmatprep.subr.mxu1 %v56_v21 }
  0x34   :  { %110 = vmatpush1.msra.mxu0 %v55_v22  ;;  %248 = vmatpush1.msra.mxu1 %v55_v22 }
  0x35   :  { %111 = vmatprep.subr.mxu0 %v54_v23  ;;  %233 = vmatprep.subr.mxu1 %v54_v23 }
  0x36   :  { %112 = vmatpush1.msra.mxu0 %v53_v24  ;;  %249 = vmatpush1.msra.mxu1 %v53_v24 }
  0x37   :  { %113 = vmatprep.subr.mxu0 %v52_v25  ;;  %234 = vmatprep.subr.mxu1 %v52_v25 }
  0x38   :  { %114 = vmatpush1.msra.mxu0 %v51_v26  ;;  %250 = vmatpush1.msra.mxu1 %v51_v26 }
  0x39   :  { %115 = vmatprep.subr.mxu0 %v50_v27  ;;  %235 = vmatprep.subr.mxu1 %v50_v27 }
  0x3a   :  { %116 = vmatpush1.msra.mxu0 %v49_v28  ;;  %251 = vmatpush1.msra.mxu1 %v49_v28 }
  0x3b   :  { %117 = vmatprep.subr.mxu0 %v48_v29  ;;  %236 = vmatprep.subr.mxu1 %v48_v29 }
  0x3c   :  { %118 = vmatpush1.msra.mxu0 %v47_v30  ;;  %252 = vmatpush1.msra.mxu1 %v47_v30 }
  0x3d   :  { %119 = vmatprep.subr.mxu0 %v46_v31  ;;  %237 = vmatprep.subr.mxu1 %v46_v31 }
  0x3e   :  { %120 = vmatpush1.msra.mxu0 %v45_v32  ;;  %253 = vmatpush1.msra.mxu1 %v45_v32 }
  0x3f   :  { %154 = vmatmul.mubr.f32.vlgmr.msra.gmra.mxu0 %v43_v33  ;;  %160 = vmatmul.mubr.f32.vlgmr.msra.gmra.mxu1 %v44_v34 }
  0xff   :  { %v155_v42 = vpop.f32.mrf.mxu0  ;;  %v161_v43 = vpop.f32.mrf.mxu1 }
 0x100   :  { %v156_v46 = vadd.f32 %v155_v42, %v82_v40  ;;  %v162_v48 = vadd.f32 %v161_v43, %v82_v40 }
 0x101   :  { %v157_v44 = vpop.f32.mrf.mxu0  ;;  %v163_v45 = vpop.f32.mrf.mxu1 }
 0x102   :  { %v158_v47 = vadd.f32 %v157_v44, %v86_v41  ;;  %v164_v49 = vadd.f32 %v163_v45, %v86_v41 }
 0x104   :  { %v166_v50 = vmax.f32 %v156_v46, %v158_v47  ;;  %v169_v51 = vmax.f32 %v162_v48, %v164_v49 }
 0x106   :  { %167 = vmax.xlane.f32.xlu0 %v166_v50 }
 0x10a   :  { %170 = vmax.xlane.f32.xlu0 %v169_v51 }
 0x18f   :  { %v168_v52 = vpop.xlane.xlu0 %167 }
 0x190   :  { %v172_v53 = vsub.f32 %v156_v46, %v168_v52  ;;  %v173_v54 = vsub.f32 %v158_v47, %v168_v52 }
 0x192   :  { %v176_v55 = vmul.f32 1.442695, %v172_v53  ;;  %v178_v56 = vmul.f32 1.442695, %v173_v54 }
 0x193   :  { %v171_v57 = vpop.xlane.xlu0 %170 }
 0x194   :  { %262 = vpow2.f32 %v176_v55  ;;  %v174_v58 = vsub.f32 %v162_v48, %v171_v57  ;;  %v175_v59 = vsub.f32 %v164_v49, %v171_v57 }
 0x195   :  { %264 = vpow2.f32 %v178_v56 }
 0x196   :  { %v180_v60 = vmul.f32 1.442695, %v174_v58  ;;  %v182_v61 = vmul.f32 1.442695, %v175_v59 }
 0x198   :  { %266 = vpow2.f32 %v180_v60 }
 0x199   :  { %268 = vpow2.f32 %v182_v61 }
 0x1a1   :  { %v263_v62 = vpop.eup %262 }
 0x1a2   :  { %v265_v63 = vpop.eup %264 }
 0x1a3   :  { %v184_v0 = vadd.f32 %v265_v63, %v263_v62 }
 0x1a5   :  { %v267_v1 = vpop.eup %266  ;;  %185 = vadd.xlane.f32.xlu1 %v184_v0 }
 0x1a6   :  { %v269_v2 = vpop.eup %268 }
 0x1a7   :  { %v187_v3 = vadd.f32 %v269_v2, %v267_v1 }
 0x1a9   :  { %188 = vadd.xlane.f32.xlu1 %v187_v3 }
 0x22e   :  { %v186_v4 = vpop.xlane.xlu1 %185 }
 0x22f   :  { %270 = vlog2.f32 %v186_v4 }
 0x232   :  { %v189_v5 = vpop.xlane.xlu1 %188 }
 0x233   :  { %272 = vlog2.f32 %v189_v5 }
 0x23c   :  { %v271_v6 = vpop.eup %270 }
 0x23d   :  { %v191_v7 = vmul.f32 0.6931472, %v271_v6 }
 0x23f   :  { %v194_v8 = vadd.f32 %v191_v7, %v168_v52 }
 0x240   :  { %v273_v9 = vpop.eup %272 }
 0x241   :  { %v196_v10 = vsub.f32 %v156_v46, %v194_v8  ;;  %v197_v11 = vsub.f32 %v158_v47, %v194_v8  ;;  %v193_v12 = vmul.f32 0.6931472, %v273_v9 }
 0x243   :  { %200 = vst [vmem:[#allocation7] sm:$0xff] %v196_v10  ;;  %201 = vst [vmem:[#allocation7 + $0x8] sm:$0xff] %v197_v11  ;;  %v195_v13 = vadd.f32 %v193_v12, %v171_v57 }
 0x245   :  { %v198_v14 = vsub.f32 %v162_v48, %v195_v13  ;;  %v199_v15 = vsub.f32 %v164_v49, %v195_v13 }
 0x247   :  { %202 = vst [vmem:[#allocation7 + $0x10] sm:$0xff] %v198_v14  ;;  %203 = vst [vmem:[#allocation7 + $0x18] sm:$0xff] %v199_v15 }
 0x248   :  { %325 = shalt.err (!%p322_p0)
}
 0x249   :  { %215 = dma.vmem_to_hbm [thread:$0]  %s210_s26, 512, %s389_s3, [#allocation4], %s344_s22, %s344_s22, %s345_s23  }
 0x24a   :  { %338 = dma.done.wait [#allocation4], 512  }
 0x24b   :  { %339 = vsyncadd [#allocation4], 4294966784 }
 0x24c   :  { %219 = vsyncpa [#allocation3], 1 }
 0x24d   :  { %220 = vsyncpa [#allocation6], 1 }
 0x24e   :  { %221 = vsyncpa [#allocation4], 1 }

</bundles_post_ra>
